<compile_context>
chip_gen: v7x
topology: tpu7x:2x2x1
jax: 0.10.0
libtpu: 0.0.40
codegen_flags: <defaults>
</compile_context>

<pallas_src>
import jax
import jax.numpy as jnp
from jax.experimental import pallas as pl
from jax.experimental.pallas import tpu as pltpu


def _round_up(n, m):
    return ((n + m - 1) // m) * m


def _sublane_multiple(dtype):
    # Sub-32-bit dtypes pack along sublanes: (8,128) f32, (16,128) bf16, (32,128) i8.
    return {4: 8, 2: 16, 1: 32}.get(jnp.dtype(dtype).itemsize, 8)


def _vmem_capacity_bytes():
    try:
        return int(pltpu.get_tpu_info().vmem_capacity_bytes)
    except Exception:
        return 64 << 20  # conservative fallback (v7x per-core VMEM)


def _spec(shape, index_map, buffers=None):
    """BlockSpec with an optional explicit buffer count (safe fallback)."""
    if buffers is not None:
        try:
            return pl.BlockSpec(shape, index_map, pipeline_mode=pl.Buffered(buffers))
        except TypeError:  # older jax without pipeline_mode kwarg
            pass
    return pl.BlockSpec(shape, index_map)


# ---------------------------------------------------------------------------
# Kernels
# ---------------------------------------------------------------------------
def ffn_kernel_resident(x_ref, w1_ref, b1_ref, w2_ref, b2_ref, w3_ref, b3_ref, o_ref):
    """All weights VMEM-resident; x/out streamed in TM-row tiles."""
    # Cast x to the weight dtype so bf16 weights keep the MXU in bf16 mode
    # (no-op for f32); accumulate in f32 via preferred_element_type.
    x = x_ref[...].astype(w1_ref.dtype)

    h1 = jnp.dot(x, w1_ref[...], preferred_element_type=jnp.float32)
    h1 = jnp.maximum(h1 + b1_ref[...], 0.0)          # biases pre-stored as f32
    # TODO(synk): train-mode dropout omitted (eval-mode identity); would be done
    # in-kernel with pltpu.prng_seed + pltpu.stateful_bernoulli.

    h2 = jnp.dot(h1.astype(w2_ref.dtype), w2_ref[...],
                 preferred_element_type=jnp.float32)
    h2 = jnp.maximum(h2 + b2_ref[...], 0.0)

    out = jnp.dot(h2.astype(w3_ref.dtype), w3_ref[...],
                  preferred_element_type=jnp.float32)
    o_ref[...] = (out + b3_ref[...]).astype(o_ref.dtype)


def ffn_kernel_hidden_tiled(x_ref, w1_ref, b1_ref, w2_ref, b2_ref, w3_ref, b3_ref,
                            o_ref, acc_ref):
    """Hidden dim tiled on grid axis 1 (arbitrary); f32 accumulator for fc2."""
    k = pl.program_id(1)

    @pl.when(k == 0)
    def _():
        acc_ref[...] = jnp.zeros_like(acc_ref)

    x = x_ref[...].astype(w1_ref.dtype)
    # Column-chunk of h1 = relu(x @ w1 + b1) for this hidden tile.
    h1 = jnp.dot(x, w1_ref[...], preferred_element_type=jnp.float32)
    h1 = jnp.maximum(h1 + b1_ref[...], 0.0)
    # Partial fc2: h1[:, chunk] @ w2[chunk, :], accumulated over k.
    acc_ref[...] += jnp.dot(h1.astype(w2_ref.dtype), w2_ref[...],
                            preferred_element_type=jnp.float32)

    @pl.when(k == pl.num_programs(1) - 1)
    def _():
        h2 = jnp.maximum(acc_ref[...] + b2_ref[...], 0.0)
        out = jnp.dot(h2.astype(w3_ref.dtype), w3_ref[...],
                      preferred_element_type=jnp.float32)
        o_ref[...] = (out + b3_ref[...]).astype(o_ref.dtype)


# ---------------------------------------------------------------------------
# Wrapper
# ---------------------------------------------------------------------------
def prepare_ffn_params(w1, b1, w2, b2, w3, b3, weight_dtype=None):
    """Pad feature dims to multiples of 128 and cast ONCE (hoisted out of forward).

    Weights are [in_features, out_features]. Zero padding is exact: padded input
    columns multiply zero weight rows, padded hidden units get zero bias (ReLU(0)=0),
    padded output columns are sliced off. Biases are stored as f32 (no per-step cast).
    """
    in_f, hid = w1.shape
    out_f = w3.shape[1]
    in_p, hid_p, out_p = _round_up(in_f, 128), _round_up(hid, 128), _round_up(out_f, 128)
    wdt = jnp.dtype(weight_dtype) if weight_dtype is not None else w1.dtype

    def padw(w, r, c):
        return jnp.pad(w, ((0, r - w.shape[0]), (0, c - w.shape[1]))).astype(wdt)

    def padb(b, c):
        b = jnp.asarray(b, jnp.float32).reshape(1, -1)
        return jnp.pad(b, ((0, 0), (0, c - b.shape[1])))

    return {
        "w1": padw(w1, in_p, hid_p), "b1": padb(b1, hid_p),
        "w2": padw(w2, hid_p, hid_p), "b2": padb(b2, hid_p),
        "w3": padw(w3, hid_p, out_p), "b3": padb(b3, out_p),
        "dims": (int(in_f), int(hid), int(out_f), int(in_p), int(hid_p), int(out_p)),
    }


def feedforward_network(x, params, *, tm=None, hid_tile=None, x_buffers=2):
    w1, b1, w2, b2, w3, b3 = (params[k] for k in ("w1", "b1", "w2", "b2", "w3", "b3"))
    in_f, hid, out_f, in_p, hid_p, out_p = params["dims"]
    batch = x.shape[0]
    x_item = jnp.dtype(x.dtype).itemsize
    w_item = jnp.dtype(w1.dtype).itemsize

    capacity = _vmem_capacity_bytes()
    budget = int(0.8 * capacity)            # headroom for compiler scratch / pipeline
    sub = _sublane_multiple(x.dtype)

    # Pad x feature dim only when not already 128-aligned (no batch padding at all).
    if in_p != in_f:
        x = jnp.pad(x, ((0, 0), (0, in_p - in_f)))

    resident_bytes = sum(int(p.size) * p.dtype.itemsize
                         for p in (w1, w2, w3, b1, b2, b3))
    use_tiled = (hid_tile is not None) or (resident_bytes > budget // 2)

    # Batch tile: dtype-aware sublane rounding, generation-aware cap.
    tm_cap = 1024 if capacity > (96 << 20) else 512   # v5e/v6e (128 MiB) vs v7x (64 MiB)
    if tm is None:
        tm = min(tm_cap, (batch // sub) * sub) if batch >= sub else sub
    tm = max(sub, (tm // sub) * sub)

    def fp_resident(t):                     # single-buffered weights + 2x streamed io
        io = 2 * t * (in_p + out_p) * x_item
        inter = 2 * t * hid_p * 4           # h1 / h2 f32 intermediates
        return resident_bytes + io + inter

    if not use_tiled:
        while tm > sub and fp_resident(tm) > budget:
            tm = max(sub, ((tm // 2) // sub) * sub)
        if fp_resident(tm) > budget:        # even smallest tile doesn't fit
            use_tiled = True

    if use_tiled:
        if hid_tile is None:
            hid_tile = 512 if hid_p % 512 == 0 else (256 if hid_p % 256 == 0 else 128)
        tk = hid_tile
        assert hid_p % tk == 0, "hidden tile must divide padded hidden dim"

        def fp_tiled(t):
            wblk = 2 * (in_p * tk + tk * hid_p) * w_item + 2 * tk * 4   # streamed w1/b1/w2
            res = hid_p * out_p * w_item + (hid_p + out_p) * 4           # resident w3/b2/b3
            io = 2 * t * (in_p + out_p) * x_item
            return wblk + res + io + t * hid_p * 4 + 2 * t * hid_p * 4

        while tm > sub and fp_tiled(tm) > budget:
            tm = max(sub, ((tm // 2) // sub) * sub)
        vmem_limit = max(8 << 20, min(budget, int(1.4 * fp_tiled(tm)) + (2 << 20)))
    else:
        vmem_limit = max(8 << 20, min(budget, int(1.4 * fp_resident(tm)) + (2 << 20)))

    def _run(single_buffer_weights):
        wbuf = 1 if single_buffer_weights else None
        xbuf = None if x_buffers == 2 else x_buffers

        if not use_tiled:
            grid = (pl.cdiv(batch, tm),)
            resident = lambda shape: _spec(shape, lambda i: (0, 0), wbuf)
            return pl.pallas_call(
                ffn_kernel_resident,
                out_shape=jax.ShapeDtypeStruct((batch, out_p), x.dtype),
                grid=grid,
                in_specs=[
                    _spec((tm, in_p), lambda i: (i, 0), xbuf),   # streamed x tiles
                    resident(w1.shape), resident(b1.shape),       # weights stay in VMEM
                    resident(w2.shape), resident(b2.shape),
                    resident(w3.shape), resident(b3.shape),
                ],
                out_specs=pl.BlockSpec((tm, out_p), lambda i: (i, 0)),
                compiler_params=pltpu.CompilerParams(
                    dimension_semantics=("parallel",),            # megacore / 2-TC split
                    vmem_limit_bytes=int(vmem_limit)),
            )(x, w1, b1, w2, b2, w3, b3)

        grid = (pl.cdiv(batch, tm), hid_p // tk)
        resident = lambda shape: _spec(shape, lambda i, k: (0, 0), wbuf)
        return pl.pallas_call(
            ffn_kernel_hidden_tiled,
            out_shape=jax.ShapeDtypeStruct((batch, out_p), x.dtype),
            grid=grid,
            in_specs=[
                _spec((tm, in_p), lambda i, k: (i, 0), xbuf),
                pl.BlockSpec((in_p, tk), lambda i, k: (0, k)),    # w1 column chunks
                pl.BlockSpec((1, tk), lambda i, k: (0, k)),       # b1 chunks
                pl.BlockSpec((tk, hid_p), lambda i, k: (k, 0)),   # w2 row chunks
                resident(b2.shape), resident(w3.shape), resident(b3.shape),
            ],
            out_specs=pl.BlockSpec((tm, out_p), lambda i, k: (i, 0)),
            scratch_shapes=[pltpu.VMEM((tm, hid_p), jnp.float32)],
            compiler_params=pltpu.CompilerParams(
                dimension_semantics=("parallel", "arbitrary"),
                vmem_limit_bytes=int(vmem_limit)),
        )(x, w1, b1, w2, b2, w3, b3)

    try:
        out = _run(single_buffer_weights=True)
    except Exception:  # fallback if Buffered(1) is unsupported by this jax build
        out = _run(single_buffer_weights=False)

    if out_p != out_f:
        out = out[:, :out_f]
    return out


def init_params(key, input_size, hidden_size, output_size, dtype=jnp.float32):
    """PyTorch-style uniform(-1/sqrt(fan_in), 1/sqrt(fan_in)) init.

    Weights are returned as [in_features, out_features] (transposed vs torch).
    """
    def linear(k, fan_in, fan_out):
        kw, kb = jax.random.split(k)
        bound = 1.0 / jnp.sqrt(fan_in)
        w = jax.random.uniform(kw, (fan_in, fan_out), dtype, -bound, bound)
        b = jax.random.uniform(kb, (1, fan_out), dtype, -bound, bound)
        return w, b

    k1, k2, k3 = jax.random.split(key, 3)
    w1, b1 = linear(k1, input_size, hidden_size)
    w2, b2 = linear(k2, hidden_size, hidden_size)
    w3, b3 = linear(k3, hidden_size, output_size)
    return w1, b1, w2, b2, w3, b3


if __name__ == "__main__":
    def reference(x, w1, b1, w2, b2, w3, b3):
        h = jnp.maximum(x @ w1 + b1, 0.0)      # eval-mode dropout == identity
        h = jnp.maximum(h @ w2 + b2, 0.0)
        return h @ w3 + b3

    # --- Test 1: small shapes, fully-resident path (f32 weights) -------------
    input_size, hidden_size, output_size, batch = 16, 32, 8, 8
    key = jax.random.PRNGKey(0)
    kx, kp = jax.random.split(key)
    x = jax.random.normal(kx, (batch, input_size), jnp.float32)
    raw = init_params(kp, input_size, hidden_size, output_size)
    params = prepare_ffn_params(*raw)           # pad/cast once, outside the forward
    out = jax.block_until_ready(feedforward_network(x, params))
    ref = reference(x, *raw)
    assert out.shape == (batch, output_size)
    assert jnp.allclose(out, ref, atol=1e-5, rtol=1e-5)

    # --- Test 2: ragged batch + hidden-tiled accumulator fallback path -------
    in2, hid2, out2_f, batch2 = 24, 256, 10, 12
    kx2, kp2 = jax.random.split(jax.random.PRNGKey(1))
    x2 = jax.random.normal(kx2, (batch2, in2), jnp.float32)
    raw2 = init_params(kp2, in2, hid2, out2_f)
    params2 = prepare_ffn_params(*raw2)
    out2 = jax.block_until_ready(feedforward_network(x2, params2, hid_tile=128))
    ref2 = reference(x2, *raw2)
    assert out2.shape == (batch2, out2_f)
    assert jnp.allclose(out2, ref2, atol=1e-4, rtol=1e-4)

    # --- Test 3: bf16 weight path (f32 MXU accumulation) ---------------------
    params_bf16 = prepare_ffn_params(*raw, weight_dtype=jnp.bfloat16)
    out3 = jax.block_until_ready(feedforward_network(x, params_bf16))
    assert jnp.allclose(out3, ref, atol=1.5e-1, rtol=1.5e-1)

    print("KERNEL_OK")
</pallas_src>

<mosaic_0001>
module attributes {stable_mosaic.version = 11 : i64} {
  func.func @ffn_kernel_resident(%arg0: i32, %arg1: memref<8x128xf32, #tpu.memory_space<vmem>>, %arg2: memref<128x128xf32, #tpu.memory_space<vmem>>, %arg3: memref<1x128xf32, #tpu.memory_space<vmem>>, %arg4: memref<128x128xf32, #tpu.memory_space<vmem>>, %arg5: memref<1x128xf32, #tpu.memory_space<vmem>>, %arg6: memref<128x128xf32, #tpu.memory_space<vmem>>, %arg7: memref<1x128xf32, #tpu.memory_space<vmem>>, %arg8: memref<8x128xf32, #tpu.memory_space<vmem>>) attributes {dimension_semantics = [#tpu.dimension_semantics<parallel>], iteration_bounds = array<i64: 1>, scalar_prefetch = 0 : i64, scratch_operands = 0 : i64, tpu.core_type = #tpu.core_type<tc>, window_params = [{transform_indices = @transform_0, window_bounds = array<i64: 8, 128>}, {pipeline_mode = #tpu.pipeline_mode<synchronous>, transform_indices = @transform_1, window_bounds = array<i64: 128, 128>}, {pipeline_mode = #tpu.pipeline_mode<synchronous>, transform_indices = @transform_2, window_bounds = array<i64: 1, 128>}, {pipeline_mode = #tpu.pipeline_mode<synchronous>, transform_indices = @transform_3, window_bounds = array<i64: 128, 128>}, {pipeline_mode = #tpu.pipeline_mode<synchronous>, transform_indices = @transform_4, window_bounds = array<i64: 1, 128>}, {pipeline_mode = #tpu.pipeline_mode<synchronous>, transform_indices = @transform_5, window_bounds = array<i64: 128, 128>}, {pipeline_mode = #tpu.pipeline_mode<synchronous>, transform_indices = @transform_6, window_bounds = array<i64: 1, 128>}, {transform_indices = @transform_7, window_bounds = array<i64: 8, 128>}]} {
    %c0 = arith.constant 0 : index
    %c0_0 = arith.constant 0 : index
    %0 = vector.load %arg1[%c0, %c0_0] : memref<8x128xf32, #tpu.memory_space<vmem>>, vector<8x128xf32>
    %c0_1 = arith.constant 0 : index
    %c0_2 = arith.constant 0 : index
    %1 = vector.load %arg2[%c0_1, %c0_2] : memref<128x128xf32, #tpu.memory_space<vmem>>, vector<128x128xf32>
    %cst = arith.constant dense<0.000000e+00> : vector<8x128xf32>
    %2 = tpu.matmul %0, %1, %cst {dimension_numbers = #tpu.dot_dimension_numbers<[1], [0], [0], [1], [0, 0, 1, 1], [], []>} : vector<8x128xf32>, vector<128x128xf32>, vector<8x128xf32> -> vector<8x128xf32>
    %c0_3 = arith.constant 0 : index
    %c0_4 = arith.constant 0 : index
    %3 = vector.load %arg3[%c0_3, %c0_4] : memref<1x128xf32, #tpu.memory_space<vmem>>, vector<1x128xf32>
    %4 = vector.broadcast %3 : vector<1x128xf32> to vector<8x128xf32>
    %5 = arith.addf %2, %4 : vector<8x128xf32>
    %cst_5 = arith.constant 0.000000e+00 : f32
    %6 = vector.broadcast %cst_5 : f32 to vector<8x128xf32>
    %7 = arith.maximumf %5, %6 : vector<8x128xf32>
    %c0_6 = arith.constant 0 : index
    %c0_7 = arith.constant 0 : index
    %8 = vector.load %arg4[%c0_6, %c0_7] : memref<128x128xf32, #tpu.memory_space<vmem>>, vector<128x128xf32>
    %cst_8 = arith.constant dense<0.000000e+00> : vector<8x128xf32>
    %9 = tpu.matmul %7, %8, %cst_8 {dimension_numbers = #tpu.dot_dimension_numbers<[1], [0], [0], [1], [0, 0, 1, 1], [], []>} : vector<8x128xf32>, vector<128x128xf32>, vector<8x128xf32> -> vector<8x128xf32>
    %c0_9 = arith.constant 0 : index
    %c0_10 = arith.constant 0 : index
    %10 = vector.load %arg5[%c0_9, %c0_10] : memref<1x128xf32, #tpu.memory_space<vmem>>, vector<1x128xf32>
    %11 = vector.broadcast %10 : vector<1x128xf32> to vector<8x128xf32>
    %12 = arith.addf %9, %11 : vector<8x128xf32>
    %cst_11 = arith.constant 0.000000e+00 : f32
    %13 = vector.broadcast %cst_11 : f32 to vector<8x128xf32>
    %14 = arith.maximumf %12, %13 : vector<8x128xf32>
    %c0_12 = arith.constant 0 : index
    %c0_13 = arith.constant 0 : index
    %15 = vector.load %arg6[%c0_12, %c0_13] : memref<128x128xf32, #tpu.memory_space<vmem>>, vector<128x128xf32>
    %cst_14 = arith.constant dense<0.000000e+00> : vector<8x128xf32>
    %16 = tpu.matmul %14, %15, %cst_14 {dimension_numbers = #tpu.dot_dimension_numbers<[1], [0], [0], [1], [0, 0, 1, 1], [], []>} : vector<8x128xf32>, vector<128x128xf32>, vector<8x128xf32> -> vector<8x128xf32>
    %c0_15 = arith.constant 0 : index
    %c0_16 = arith.constant 0 : index
    %17 = vector.load %arg7[%c0_15, %c0_16] : memref<1x128xf32, #tpu.memory_space<vmem>>, vector<1x128xf32>
    %18 = vector.broadcast %17 : vector<1x128xf32> to vector<8x128xf32>
    %19 = arith.addf %16, %18 : vector<8x128xf32>
    %c0_17 = arith.constant 0 : index
    %c0_18 = arith.constant 0 : index
    %20 = vector.load %arg8[%c0_17, %c0_18] : memref<8x128xf32, #tpu.memory_space<vmem>>, vector<8x128xf32>
    tpu.vector_store %arg8[%c0_17, %c0_18], %19 {strides = array<i32>} : memref<8x128xf32, #tpu.memory_space<vmem>>, vector<8x128xf32>,
    return
  }
  func.func @transform_0(%arg0: i32) -> (i32, i32) {
    %c0_i32 = arith.constant 0 : i32
    %c0_i32_0 = arith.constant 0 : i32
    return %arg0, %c0_i32 : i32, i32
  }
  func.func @transform_1(%arg0: i32) -> (i32, i32) {
    %c0_i32 = arith.constant 0 : i32
    %c0_i32_0 = arith.constant 0 : i32
    %c0_i32_1 = arith.constant 0 : i32
    return %c0_i32, %c0_i32_0 : i32, i32
  }
  func.func @transform_2(%arg0: i32) -> (i32, i32) {
    %c0_i32 = arith.constant 0 : i32
    %c0_i32_0 = arith.constant 0 : i32
    %c0_i32_1 = arith.constant 0 : i32
    return %c0_i32, %c0_i32_0 : i32, i32
  }
  func.func @transform_3(%arg0: i32) -> (i32, i32) {
    %c0_i32 = arith.constant 0 : i32
    %c0_i32_0 = arith.constant 0 : i32
    %c0_i32_1 = arith.constant 0 : i32
    return %c0_i32, %c0_i32_0 : i32, i32
  }
  func.func @transform_4(%arg0: i32) -> (i32, i32) {
    %c0_i32 = arith.constant 0 : i32
    %c0_i32_0 = arith.constant 0 : i32
    %c0_i32_1 = arith.constant 0 : i32
    return %c0_i32, %c0_i32_0 : i32, i32
  }
  func.func @transform_5(%arg0: i32) -> (i32, i32) {
    %c0_i32 = arith.constant 0 : i32
    %c0_i32_0 = arith.constant 0 : i32
    %c0_i32_1 = arith.constant 0 : i32
    return %c0_i32, %c0_i32_0 : i32, i32
  }
  func.func @transform_6(%arg0: i32) -> (i32, i32) {
    %c0_i32 = arith.constant 0 : i32
    %c0_i32_0 = arith.constant 0 : i32
    %c0_i32_1 = arith.constant 0 : i32
    return %c0_i32, %c0_i32_0 : i32, i32
  }
  func.func @transform_7(%arg0: i32) -> (i32, i32) {
    %c0_i32 = arith.constant 0 : i32
    %c0_i32_0 = arith.constant 0 : i32
    return %arg0, %c0_i32 : i32, i32
  }
}

module attributes {stable_mosaic.version = 11 : i64} {
  func.func @ffn_kernel_resident(%arg0: i32, %arg1: memref<8x128xf32, #tpu.memory_space<vmem>>, %arg2: memref<128x128xf32, #tpu.memory_space<vmem>>, %arg3: memref<1x128xf32, #tpu.memory_space<vmem>>, %arg4: memref<128x128xf32, #tpu.memory_space<vmem>>, %arg5: memref<1x128xf32, #tpu.memory_space<vmem>>, %arg6: memref<128x128xf32, #tpu.memory_space<vmem>>, %arg7: memref<1x128xf32, #tpu.memory_space<vmem>>, %arg8: memref<8x128xf32, #tpu.memory_space<vmem>>) attributes {dimension_semantics = [#tpu.dimension_semantics<parallel>], iteration_bounds = array<i64: 1>, scalar_prefetch = 0 : i64, scratch_operands = 0 : i64, tpu.core_type = #tpu.core_type<tc>, window_params = [{transform_indices = @transform_0, window_bounds = array<i64: 8, 128>}, {pipeline_mode = #tpu.pipeline_mode<synchronous>, transform_indices = @transform_1, window_bounds = array<i64: 128, 128>}, {pipeline_mode = #tpu.pipeline_mode<synchronous>, transform_indices = @transform_2, window_bounds = array<i64: 1, 128>}, {pipeline_mode = #tpu.pipeline_mode<synchronous>, transform_indices = @transform_3, window_bounds = array<i64: 128, 128>}, {pipeline_mode = #tpu.pipeline_mode<synchronous>, transform_indices = @transform_4, window_bounds = array<i64: 1, 128>}, {pipeline_mode = #tpu.pipeline_mode<synchronous>, transform_indices = @transform_5, window_bounds = array<i64: 128, 128>}, {pipeline_mode = #tpu.pipeline_mode<synchronous>, transform_indices = @transform_6, window_bounds = array<i64: 1, 128>}, {transform_indices = @transform_7, window_bounds = array<i64: 8, 128>}]} {
    %c0 = arith.constant 0 : index
    %c0_0 = arith.constant 0 : index
    %0 = vector.load %arg1[%c0, %c0_0] : memref<8x128xf32, #tpu.memory_space<vmem>>, vector<8x128xf32>
    %c0_1 = arith.constant 0 : index
    %c0_2 = arith.constant 0 : index
    %1 = vector.load %arg2[%c0_1, %c0_2] : memref<128x128xf32, #tpu.memory_space<vmem>>, vector<128x128xf32>
    %cst = arith.constant dense<0.000000e+00> : vector<8x128xf32>
    %2 = tpu.matmul %0, %1, %cst {dimension_numbers = #tpu.dot_dimension_numbers<[1], [0], [0], [1], [0, 0, 1, 1], [], []>} : vector<8x128xf32>, vector<128x128xf32>, vector<8x128xf32> -> vector<8x128xf32>
    %c0_3 = arith.constant 0 : index
    %c0_4 = arith.constant 0 : index
    %3 = vector.load %arg3[%c0_3, %c0_4] : memref<1x128xf32, #tpu.memory_space<vmem>>, vector<1x128xf32>
    %4 = vector.broadcast %3 : vector<1x128xf32> to vector<8x128xf32>
    %5 = arith.addf %2, %4 : vector<8x128xf32>
    %cst_5 = arith.constant 0.000000e+00 : f32
    %6 = vector.broadcast %cst_5 : f32 to vector<8x128xf32>
    %7 = arith.maximumf %5, %6 : vector<8x128xf32>
    %c0_6 = arith.constant 0 : index
    %c0_7 = arith.constant 0 : index
    %8 = vector.load %arg4[%c0_6, %c0_7] : memref<128x128xf32, #tpu.memory_space<vmem>>, vector<128x128xf32>
    %cst_8 = arith.constant dense<0.000000e+00> : vector<8x128xf32>
    %9 = tpu.matmul %7, %8, %cst_8 {dimension_numbers = #tpu.dot_dimension_numbers<[1], [0], [0], [1], [0, 0, 1, 1], [], []>} : vector<8x128xf32>, vector<128x128xf32>, vector<8x128xf32> -> vector<8x128xf32>
    %c0_9 = arith.constant 0 : index
    %c0_10 = arith.constant 0 : index
    %10 = vector.load %arg5[%c0_9, %c0_10] : memref<1x128xf32, #tpu.memory_space<vmem>>, vector<1x128xf32>
    %11 = vector.broadcast %10 : vector<1x128xf32> to vector<8x128xf32>
    %12 = arith.addf %9, %11 : vector<8x128xf32>
    %cst_11 = arith.constant 0.000000e+00 : f32
    %13 = vector.broadcast %cst_11 : f32 to vector<8x128xf32>
    %14 = arith.maximumf %12, %13 : vector<8x128xf32>
    %c0_12 = arith.constant 0 : index
    %c0_13 = arith.constant 0 : index
    %15 = vector.load %arg6[%c0_12, %c0_13] : memref<128x128xf32, #tpu.memory_space<vmem>>, vector<128x128xf32>
    %cst_14 = arith.constant dense<0.000000e+00> : vector<8x128xf32>
    %16 = tpu.matmul %14, %15, %cst_14 {dimension_numbers = #tpu.dot_dimension_numbers<[1], [0], [0], [1], [0, 0, 1, 1], [], []>} : vector<8x128xf32>, vector<128x128xf32>, vector<8x128xf32> -> vector<8x128xf32>
    %c0_15 = arith.constant 0 : index
    %c0_16 = arith.constant 0 : index
    %17 = vector.load %arg7[%c0_15, %c0_16] : memref<1x128xf32, #tpu.memory_space<vmem>>, vector<1x128xf32>
    %18 = vector.broadcast %17 : vector<1x128xf32> to vector<8x128xf32>
    %19 = arith.addf %16, %18 : vector<8x128xf32>
    %c0_17 = arith.constant 0 : index
    %c0_18 = arith.constant 0 : index
    %20 = vector.load %arg8[%c0_17, %c0_18] : memref<8x128xf32, #tpu.memory_space<vmem>>, vector<8x128xf32>
    tpu.vector_store %arg8[%c0_17, %c0_18], %19 {strides = array<i32>} : memref<8x128xf32, #tpu.memory_space<vmem>>, vector<8x128xf32>,
    return
  }
  func.func @transform_0(%arg0: i32) -> (i32, i32) {
    %c0_i32 = arith.constant 0 : i32
    %c0_i32_0 = arith.constant 0 : i32
    return %arg0, %c0_i32 : i32, i32
  }
  func.func @transform_1(%arg0: i32) -> (i32, i32) {
    %c0_i32 = arith.constant 0 : i32
    %c0_i32_0 = arith.constant 0 : i32
    %c0_i32_1 = arith.constant 0 : i32
    return %c0_i32, %c0_i32_0 : i32, i32
  }
  func.func @transform_2(%arg0: i32) -> (i32, i32) {
    %c0_i32 = arith.constant 0 : i32
    %c0_i32_0 = arith.constant 0 : i32
    %c0_i32_1 = arith.constant 0 : i32
    return %c0_i32, %c0_i32_0 : i32, i32
  }
  func.func @transform_3(%arg0: i32) -> (i32, i32) {
    %c0_i32 = arith.constant 0 : i32
    %c0_i32_0 = arith.constant 0 : i32
    %c0_i32_1 = arith.constant 0 : i32
    return %c0_i32, %c0_i32_0 : i32, i32
  }
  func.func @transform_4(%arg0: i32) -> (i32, i32) {
    %c0_i32 = arith.constant 0 : i32
    %c0_i32_0 = arith.constant 0 : i32
    %c0_i32_1 = arith.constant 0 : i32
    return %c0_i32, %c0_i32_0 : i32, i32
  }
  func.func @transform_5(%arg0: i32) -> (i32, i32) {
    %c0_i32 = arith.constant 0 : i32
    %c0_i32_0 = arith.constant 0 : i32
    %c0_i32_1 = arith.constant 0 : i32
    return %c0_i32, %c0_i32_0 : i32, i32
  }
  func.func @transform_6(%arg0: i32) -> (i32, i32) {
    %c0_i32 = arith.constant 0 : i32
    %c0_i32_0 = arith.constant 0 : i32
    %c0_i32_1 = arith.constant 0 : i32
    return %c0_i32, %c0_i32_0 : i32, i32
  }
  func.func @transform_7(%arg0: i32) -> (i32, i32) {
    %c0_i32 = arith.constant 0 : i32
    %c0_i32_0 = arith.constant 0 : i32
    return %arg0, %c0_i32 : i32, i32
  }
}

</mosaic_0001>

<bundles_post_ra>
// kernel: tpu_custom_call.1
= control target key start
LH: loop header
LB: loop body
LE: loop exit
PB: predicated region body
PF: predicated region fallthrough
CT: control target
= control target key end

     0   :  { %12 = vsyncpa [#allocation3], 0  ;;  %s897_s0 = inlined_call_operand.hbm [shape: f32[8,128], index: 0, kind: input, shape index: {}]   ;;  %s898_s1 = inlined_call_operand.hbm [shape: f32[128,128], index: 1, kind: input, shape index: {}]   ;;  %s899_s2 = inlined_call_operand.vmem [shape: f32[1,128], index: 2, kind: input, shape index: {}]   ;;  %s900_s3 = inlined_call_operand.hbm [shape: f32[128,128], index: 3, kind: input, shape index: {}]   ;;  %s901_s4 = inlined_call_operand.vmem [shape: f32[1,128], index: 4, kind: input, shape index: {}]   ;;  %s902_s5 = inlined_call_operand.hbm [shape: f32[128,128], index: 5, kind: input, shape index: {}]   ;;  %s903_s6 = inlined_call_operand.vmem [shape: f32[1,128], index: 6, kind: input, shape index: {}]   ;;  %s904_s7 = inlined_call_operand.hbm [shape: f32[8,128], index: 7, kind: output, shape index: {}]  }
   0x1   :  { %13 = vsyncpa [#allocation6], 0 }
   0x2   :  { %14 = vsyncpa [#allocation9], 0 }
   0x3   :  { %15 = vsyncpa [#allocation4], 0  ;;  %s739_s24 = smov [#allocation5]   ;;  %s621_s28 = scalar_lea.hbm %s898_s1, 2048 }
   0x4   :  { %s31_s25 = sshll.u32 %s739_s24, 4  ;;  %p622_p0 = scmp.ne.s32.totalorder %s898_s1, %s621_s28  ;;  %s32_s25 = int_to_ptr.vmem [resolvable:$true] %s31_s25 }
   0x5   :  { %p625_p1 = scmp.lt.u32.totalorder %s621_s28, %s898_s1 }
   0x7   :  { %p627_p2 = pnand %p625_p1, %p622_p0 }
   0x9   :  { %630 = shalt.err (!%p627_p2)
}
   0xa   :  { %s631_s10 = scalar_lea.vmem %s32_s25, 2048  ;;  %p636_p4 = scmp.lt.s32.totalorder %s32_s25, %s32_s25 }
   0xb   :  { %p632_p3 = scmp.ne.s32.totalorder %s32_s25, %s631_s10  ;;  %p637_p5 = scmp.lt.s32.totalorder %s631_s10, %s631_s10 }
   0xd   :  { %p638_p6 = por %p637_p5, %p636_p4 }
   0xf   :  { %p639_p7 = pnand %p638_p6, %p632_p3 }
  0x11   :  { %642 = shalt.err (!%p639_p7)
}
  0x12   :  { %s740_s11 = smov 128   ;;  %s741_s12 = smov 8  }
  0x13   :  { %37 = dma.hbm_to_vmem [thread:$0]  %s898_s1, 2048, %s32_s25, [#allocation6], %s740_s11, %s740_s11, %s741_s12  }
  0x14   :  { %s742_s15 = smov [#allocation2]   ;;  %s743_s17 = smov [#allocation7]  }
  0x15   :  { %s22_s16 = sshll.u32 %s742_s15, 4  ;;  %s45_s18 = sshll.u32 %s743_s17, 4  ;;  %s23_s16 = int_to_ptr.vmem [resolvable:$true] %s22_s16  ;;  %s46_s18 = int_to_ptr.vmem [resolvable:$true] %s45_s18 }
  0x16   :  { %s643_s21 = scalar_lea.hbm %s897_s0, 128 }
  0x17   :  { %p644_p8 = scmp.ne.s32.totalorder %s897_s0, %s643_s21  ;;  %p647_p9 = scmp.lt.u32.totalorder %s643_s21, %s897_s0 }
  0x19   :  { %p649_p10 = pnand %p647_p9, %p644_p8 }
  0x1b   :  { %652 = shalt.err (!%p649_p10)
}
  0x1c   :  { %s653_s1 = scalar_lea.vmem %s23_s16, 128  ;;  %p658_p12 = scmp.lt.s32.totalorder %s23_s16, %s23_s16 }
  0x1d   :  { %p654_p11 = scmp.ne.s32.totalorder %s23_s16, %s653_s1  ;;  %p659_p13 = scmp.lt.s32.totalorder %s653_s1, %s653_s1 }
  0x1f   :  { %p660_p0 = por %p659_p13, %p658_p12 }
  0x21   :  { %p661_p1 = pnand %p660_p0, %p654_p11 }
  0x23   :  { %664 = shalt.err (!%p661_p1)
}
  0x24   :  { %25 = dma.hbm_to_vmem [thread:$0]  %s897_s0, 128, %s23_s16, [#allocation3]  }
  0x25   :  { %s665_s30 = scalar_lea.hbm %s900_s3, 2048 }
  0x26   :  { %p666_p2 = scmp.ne.s32.totalorder %s900_s3, %s665_s30  ;;  %p669_p3 = scmp.lt.u32.totalorder %s665_s30, %s900_s3 }
  0x28   :  { %p671_p4 = pnand %p669_p3, %p666_p2 }
  0x2a   :  { %674 = shalt.err (!%p671_p4)
}
  0x2b   :  { %s675_s14 = scalar_lea.vmem %s46_s18, 2048  ;;  %p680_p6 = scmp.lt.s32.totalorder %s46_s18, %s46_s18 }
  0x2c   :  { %p676_p5 = scmp.ne.s32.totalorder %s46_s18, %s675_s14  ;;  %p681_p7 = scmp.lt.s32.totalorder %s675_s14, %s675_s14 }
  0x2e   :  { %p682_p8 = por %p681_p7, %p680_p6 }
  0x30   :  { %p683_p9 = pnand %p682_p8, %p676_p5 }
  0x32   :  { %686 = shalt.err (!%p683_p9)
}
  0x33   :  { %51 = dma.hbm_to_vmem [thread:$0]  %s900_s3, 2048, %s46_s18, [#allocation6], %s740_s11, %s740_s11, %s741_s12  }
  0x34   :  { %s744_s16 = smov [#allocation8]   ;;  %s687_s21 = scalar_lea.hbm %s902_s5, 2048 }
  0x35   :  { %s59_s17 = sshll.u32 %s744_s16, 4  ;;  %p688_p10 = scmp.ne.s32.totalorder %s902_s5, %s687_s21  ;;  %s60_s17 = int_to_ptr.vmem [resolvable:$true] %s59_s17 }
  0x36   :  { %p691_p11 = scmp.lt.u32.totalorder %s687_s21, %s902_s5 }
  0x38   :  { %p693_p12 = pnand %p691_p11, %p688_p10 }
  0x3a   :  { %696 = shalt.err (!%p693_p12)
}
  0x3b   :  { %s697_s1 = scalar_lea.vmem %s60_s17, 2048  ;;  %p702_p0 = scmp.lt.s32.totalorder %s60_s17, %s60_s17 }
  0x3c   :  { %p698_p13 = scmp.ne.s32.totalorder %s60_s17, %s697_s1  ;;  %p703_p1 = scmp.lt.s32.totalorder %s697_s1, %s697_s1 }
  0x3e   :  { %p704_p2 = por %p703_p1, %p702_p0 }
  0x40   :  { %p705_p3 = pnand %p704_p2, %p698_p13 }
  0x42   :  { %708 = shalt.err (!%p705_p3)
}
  0x43   :  { %65 = dma.hbm_to_vmem [thread:$0]  %s902_s5, 2048, %s60_s17, [#allocation9], %s740_s11, %s740_s11, %s741_s12  }
  0x44   :  { %731 = dma.done.wait [#allocation3], 128  }
  0x45   :  { %732 = vsyncadd [#allocation3], 4294967168 }
  0x46   :  { %733 = dma.done.wait [#allocation6], 4096  }
  0x47   :  { %734 = vsyncadd [#allocation6], 4294963200 }
  0x48   :  { %735 = dma.done.wait [#allocation9], 2048  }
  0x49   :  { %736 = vsyncadd [#allocation9], 4294965248  ;;  %v745_v0 = vmov 0.0|0.0   ;;  %vm746_vm0 = vmmov 0   ;;  %v747_v1 = vmov 0.0   ;;  %v81_v2 = vld [vmem:[#allocation5] sm:$0xff] }
  0x4a   :  { %539 = vmatprep.subr.bf16.mxu0 %v745_v0  ;;  %466 = vmatprep.mubr.msk.f32.mxu0 %vm746_vm0, %v747_v1  ;;  %v82_v3 = vld [vmem:[#allocation5 + $0x8] sm:$0xff]  ;;  %v83_v4 = vld [vmem:[#allocation5 + $0x10] sm:$0xff]  ;;  %v84_v6 = vld [vmem:[#allocation5 + $0x18] sm:$0xff]  ;;  %s748_s28 = smov [#allocation10]  }
  0x4b   :  { %563 = vmatprep.subr.bf16.mxu1 %v745_v0  ;;  %501 = vmatprep.mubr.msk.f32.mxu1 %vm746_vm0, %v747_v1  ;;  %v540_v5 = vpack.c.bf16 %v82_v3, %v81_v2  ;;  %v543_v7 = vpack.c.bf16 %v84_v6, %v83_v4  ;;  %v85_v8 = vld [vmem:[#allocation5 + $0x20] sm:$0xff]  ;;  %v86_v9 = vld [vmem:[#allocation5 + $0x28] sm:$0xff]  ;;  %v177_v12 = vld [vmem:[#allocation7 + $0x10] sm:$0xff]  ;;  %s369_s29 = sshll.u32 %s748_s28, 4  ;;  %s370_s29 = int_to_ptr.vmem [resolvable:$true] %s369_s29 }
  0x4c   :  { %v175_v10 = vld [vmem:[#allocation7] sm:$0xff]  ;;  %v176_v11 = vld [vmem:[#allocation7 + $0x8] sm:$0xff]  ;;  %v178_v13 = vld [vmem:[#allocation7 + $0x18] sm:$0xff]  ;;  %v546_v14 = vpack.c.bf16 %v86_v9, %v85_v8  ;;  %s709_s30 = scalar_lea.vmem %s370_s29, 128  ;;  %p714_p5 = scmp.lt.s32.totalorder %s370_s29, %s370_s29 }
  0x4d   :  { %541 = vmatpush3.bf16.msra.mxu0 %v540_v5  ;;  %v564_v15 = vpack.c.bf16 %v176_v11, %v175_v10  ;;  %v87_v16 = vld [vmem:[#allocation5 + $0x30] sm:$0xff]  ;;  %v88_v17 = vld [vmem:[#allocation5 + $0x38] sm:$0xff]  ;;  %v567_v18 = vpack.c.bf16 %v178_v13, %v177_v12  ;;  %v179_v19 = vld [vmem:[#allocation7 + $0x20] sm:$0xff]  ;;  %p710_p4 = scmp.ne.s32.totalorder %s370_s29, %s709_s30  ;;  %p715_p6 = scmp.lt.s32.totalorder %s709_s30, %s709_s30 }
  0x4e   :  { %542 = vmatprep.subr.bf16.mxu0 %v745_v0  ;;  %v180_v20 = vld [vmem:[#allocation7 + $0x28] sm:$0xff]  ;;  %v549_v21 = vpack.c.bf16 %v88_v17, %v87_v16  ;;  %v89_v22 = vld [vmem:[#allocation5 + $0x40] sm:$0xff]  ;;  %v181_v25 = vld [vmem:[#allocation7 + $0x30] sm:$0xff] }
  0x4f   :  { %565 = vmatpush3.bf16.msra.mxu1 %v564_v15  ;;  %v90_v23 = vld [vmem:[#allocation5 + $0x48] sm:$0xff]  ;;  %v570_v24 = vpack.c.bf16 %v180_v20, %v179_v19  ;;  %v182_v26 = vld [vmem:[#allocation7 + $0x38] sm:$0xff]  ;;  %v91_v28 = vld [vmem:[#allocation5 + $0x50] sm:$0xff]  ;;  %p716_p7 = por %p715_p6, %p714_p5 }
  0x50   :  { %566 = vmatprep.subr.bf16.mxu1 %v745_v0  ;;  %v552_v27 = vpack.c.bf16 %v90_v23, %v89_v22  ;;  %v92_v29 = vld [vmem:[#allocation5 + $0x58] sm:$0xff]  ;;  %v573_v30 = vpack.c.bf16 %v182_v26, %v181_v25  ;;  %v183_v31 = vld [vmem:[#allocation7 + $0x40] sm:$0xff]  ;;  %v184_v32 = vld [vmem:[#allocation7 + $0x48] sm:$0xff] }
  0x51   :  { %544 = vmatpush3.bf16.msra.mxu0 %v543_v7  ;;  %v555_v33 = vpack.c.bf16 %v92_v29, %v91_v28  ;;  %v93_v34 = vld [vmem:[#allocation5 + $0x60] sm:$0xff]  ;;  %v94_v35 = vld [vmem:[#allocation5 + $0x68] sm:$0xff]  ;;  %v576_v36 = vpack.c.bf16 %v184_v32, %v183_v31  ;;  %v185_v37 = vld [vmem:[#allocation7 + $0x50] sm:$0xff]  ;;  %p717_p8 = pnand %p716_p7, %p710_p4 }
  0x52   :  { %545 = vmatprep.subr.bf16.mxu0 %v745_v0  ;;  %v186_v38 = vld [vmem:[#allocation7 + $0x58] sm:$0xff]  ;;  %v558_v39 = vpack.c.bf16 %v94_v35, %v93_v34  ;;  %v95_v40 = vld [vmem:[#allocation5 + $0x70] sm:$0xff]  ;;  %v187_v43 = vld [vmem:[#allocation7 + $0x60] sm:$0xff] }
  0x53   :  { %568 = vmatpush3.bf16.msra.mxu1 %v567_v18  ;;  %v96_v41 = vld [vmem:[#allocation5 + $0x78] sm:$0xff]  ;;  %v579_v42 = vpack.c.bf16 %v186_v38, %v185_v37  ;;  %v188_v44 = vld [vmem:[#allocation7 + $0x68] sm:$0xff]  ;;  %v189_v48 = vld [vmem:[#allocation7 + $0x70] sm:$0xff] }
  0x54   :  { %569 = vmatprep.subr.bf16.mxu1 %v745_v0  ;;  %v561_v45 = vpack.c.bf16 %v96_v41, %v95_v40  ;;  %v582_v46 = vpack.c.bf16 %v188_v44, %v187_v43  ;;  %v80_v47 = vld [vmem:[#allocation2] sm:$0xff]  ;;  %v269_v51 = vld [vmem:[#allocation8] sm:$0xff]  ;;  %v270_v52 = vld [vmem:[#allocation8 + $0x8] sm:$0xff] }
  0x55   :  { %547 = vmatpush3.bf16.msra.mxu0 %v546_v14  ;;  %v190_v49 = vld [vmem:[#allocation7 + $0x78] sm:$0xff]  ;;  %v271_v53 = vld [vmem:[#allocation8 + $0x10] sm:$0xff]  ;;  %v588_v54 = vpack.c.bf16 %v270_v52, %v269_v51  ;;  %v273_v57 = vld [vmem:[#allocation8 + $0x20] sm:$0xff] }
  0x56   :  { %548 = vmatprep.subr.bf16.mxu0 %v745_v0  ;;  %v585_v50 = vpack.c.bf16 %v190_v49, %v189_v48  ;;  %v272_v55 = vld [vmem:[#allocation8 + $0x18] sm:$0xff]  ;;  %v274_v58 = vld [vmem:[#allocation8 + $0x28] sm:$0xff]  ;;  %v275_v60 = vld [vmem:[#allocation8 + $0x30] sm:$0xff] }
  0x57   :  { %571 = vmatpush3.bf16.msra.mxu1 %v570_v24  ;;  %v591_v56 = vpack.c.bf16 %v272_v55, %v271_v53  ;;  %v594_v59 = vpack.c.bf16 %v274_v58, %v273_v57  ;;  %v276_v61 = vld [vmem:[#allocation8 + $0x38] sm:$0xff]  ;;  %v277_v63 = vld [vmem:[#allocation8 + $0x40] sm:$0xff]  ;;  %v279_v3 = vld [vmem:[#allocation8 + $0x50] sm:$0xff] }
  0x58   :  { %572 = vmatprep.subr.bf16.mxu1 %v745_v0  ;;  %v597_v62 = vpack.c.bf16 %v276_v61, %v275_v60  ;;  %v280_v4 = vld [vmem:[#allocation8 + $0x58] sm:$0xff]  ;;  %v281_v6 = vld [vmem:[#allocation8 + $0x60] sm:$0xff]  ;;  %v282_v7 = vld [vmem:[#allocation8 + $0x68] sm:$0xff] }
  0x59   :  { %550 = vmatpush3.bf16.msra.mxu0 %v549_v21  ;;  %v603_v5 = vpack.c.bf16 %v280_v4, %v279_v3  ;;  %v606_v8 = vpack.c.bf16 %v282_v7, %v281_v6  ;;  %v380_v9 = vld [vmem:[%s899_s2] ss:$0 sm:$0xff]  ;;  %v283_v14 = vld [vmem:[#allocation8 + $0x70] sm:$0xff] }
  0x5a   :  { %551 = vmatprep.subr.bf16.mxu0 %v745_v0  ;;  %v284_v15 = vld [vmem:[#allocation8 + $0x78] sm:$0xff] }
  0x5b   :  { %574 = vmatpush3.bf16.msra.mxu1 %v573_v30  ;;  %v609_v16 = vpack.c.bf16 %v284_v15, %v283_v14  ;;  %v381_v17 = vld [vmem:[%s901_s4] ss:$0 sm:$0xff] }
  0x5c   :  { %575 = vmatprep.subr.bf16.mxu1 %v745_v0  ;;  %v382_v21 = vld [vmem:[%s903_s6] ss:$0 sm:$0xff] }
  0x5d   :  { %553 = vmatpush3.bf16.msra.mxu0 %v552_v27 }
  0x5e   :  { %554 = vmatprep.subr.bf16.mxu0 %v745_v0 }
  0x5f   :  { %577 = vmatpush3.bf16.msra.mxu1 %v576_v36 }
  0x60   :  { %578 = vmatprep.subr.bf16.mxu1 %v745_v0 }
  0x61   :  { %556 = vmatpush3.bf16.msra.mxu0 %v555_v33 }
  0x62   :  { %557 = vmatprep.subr.bf16.mxu0 %v745_v0 }
  0x63   :  { %580 = vmatpush3.bf16.msra.mxu1 %v579_v42 }
  0x64   :  { %581 = vmatprep.subr.bf16.mxu1 %v745_v0 }
  0x65   :  { %559 = vmatpush3.bf16.msra.mxu0 %v558_v39 }
  0x66   :  { %560 = vmatprep.subr.bf16.mxu0 %v745_v0 }
  0x67   :  { %583 = vmatpush3.bf16.msra.mxu1 %v582_v46 }
  0x68   :  { %584 = vmatprep.subr.bf16.mxu1 %v745_v0 }
  0x69   :  { %562 = vmatpush3.bf16.msra.mxu0 %v561_v45 }
  0x6a   :  { %587 = vmatprep.subr.bf16.mxu0 %v745_v0 }
  0x6b   :  { %586 = vmatpush3.bf16.msra.mxu1 %v585_v50 }
  0x6c   :  { %467 = vmatmul.mubr.f32.vlgmr.msra.gmra.mrb[0].mxu0 %v80_v47 }
  0x6d   :  { %536 = vmatprep.mubr.msk.f32.mxu0 %vm746_vm0, %v747_v1  ;;  %589 = vmatpush3.bf16.msra.mxu0 %v588_v54  ;;  %v278_v1 = vld [vmem:[#allocation8 + $0x48] sm:$0xff] }
  0x6e   :  { %590 = vmatprep.subr.bf16.mxu0 %v745_v0  ;;  %v600_v2 = vpack.c.bf16 %v278_v1, %v277_v63 }
  0x71   :  { %592 = vmatpush3.bf16.msra.mxu0 %v591_v56 }
  0x72   :  { %593 = vmatprep.subr.bf16.mxu0 %v745_v0 }
  0x75   :  { %595 = vmatpush3.bf16.msra.mxu0 %v594_v59 }
  0x76   :  { %596 = vmatprep.subr.bf16.mxu0 %v745_v0 }
  0x79   :  { %598 = vmatpush3.bf16.msra.mxu0 %v597_v62 }
  0x7a   :  { %599 = vmatprep.subr.bf16.mxu0 %v745_v0 }
  0x7d   :  { %601 = vmatpush3.bf16.msra.mxu0 %v600_v2 }
  0x7e   :  { %602 = vmatprep.subr.bf16.mxu0 %v745_v0 }
  0x81   :  { %604 = vmatpush3.bf16.msra.mxu0 %v603_v5 }
  0x82   :  { %605 = vmatprep.subr.bf16.mxu0 %v745_v0 }
  0x85   :  { %607 = vmatpush3.bf16.msra.mxu0 %v606_v8 }
  0x86   :  { %608 = vmatprep.subr.bf16.mxu0 %v745_v0 }
  0x89   :  { %610 = vmatpush3.bf16.msra.mxu0 %v609_v16 }
 0x13f   :  { %v170_v10 = vpop.f32.mrb[0].mxu0 }
 0x140   :  { %v171_v11 = vadd.f32 %v380_v9, %v170_v10  ;;  %v468_v12 = vpop.f32.mrb[1].mxu0 }
 0x142   :  { %v174_v13 = vmax.f32 %v171_v11, 0.0 }
 0x144   :  { %502 = vmatmul.mubr.f32.vlgmr.msra.gmra.mrb[0].mxu1 %v174_v13 }
 0x217   :  { %v264_v18 = vpop.f32.mrb[0].mxu1 }
 0x218   :  { %v265_v19 = vadd.f32 %v381_v17, %v264_v18  ;;  %v503_v0 = vpop.f32.mrb[1].mxu1 }
 0x21a   :  { %v268_v20 = vmax.f32 %v265_v19, 0.0 }
 0x21c   :  { %537 = vmatmul.mubr.f32.vlgmr.msra.gmra.mrb[2].mxu0 %v268_v20 }
 0x2ef   :  { %v358_v22 = vpop.f32.mrb[2].mxu0 }
 0x2f0   :  { %v359_v23 = vadd.f32 %v382_v21, %v358_v22  ;;  %v538_v24 = vpop.f32.mrb[3].mxu0 }
 0x2f2   :  { %362 = vst [vmem:[#allocation10] sm:$0xff] %v359_v23 }
 0x2f3   :  { %720 = shalt.err (!%p717_p8)
}
 0x2f4   :  { %s721_s9 = scalar_lea.hbm %s904_s7, 128 }
 0x2f5   :  { %p722_p9 = scmp.ne.s32.totalorder %s904_s7, %s721_s9  ;;  %p725_p10 = scmp.lt.u32.totalorder %s721_s9, %s904_s7 }
 0x2f7   :  { %p727_p11 = pnand %p725_p10, %p722_p9 }
 0x2f9   :  { %730 = shalt.err (!%p727_p11)
}
 0x2fa   :  { %372 = dma.vmem_to_hbm [thread:$0]  %s370_s29, 128, %s904_s7, [#allocation4]  }
 0x2fb   :  { %737 = dma.done.wait [#allocation4], 128  }
 0x2fc   :  { %738 = vsyncadd [#allocation4], 4294967168 }
 0x2fd   :  { %376 = vsyncpa [#allocation3], 1 }
 0x2fe   :  { %377 = vsyncpa [#allocation6], 1 }
 0x2ff   :  { %378 = vsyncpa [#allocation9], 1 }
 0x300   :  { %379 = vsyncpa [#allocation4], 1 }

// kernel: tpu_custom_call.1
= control target key start
LH: loop header
LB: loop body
LE: loop exit
PB: predicated region body
PF: predicated region fallthrough
CT: control target
= control target key end

     0   :  { %12 = vsyncpa [#allocation3], 0  ;;  %s897_s0 = inlined_call_operand.hbm [shape: f32[8,128], index: 0, kind: input, shape index: {}]   ;;  %s898_s1 = inlined_call_operand.hbm [shape: f32[128,128], index: 1, kind: input, shape index: {}]   ;;  %s899_s2 = inlined_call_operand.vmem [shape: f32[1,128], index: 2, kind: input, shape index: {}]   ;;  %s900_s3 = inlined_call_operand.hbm [shape: f32[128,128], index: 3, kind: input, shape index: {}]   ;;  %s901_s4 = inlined_call_operand.vmem [shape: f32[1,128], index: 4, kind: input, shape index: {}]   ;;  %s902_s5 = inlined_call_operand.hbm [shape: f32[128,128], index: 5, kind: input, shape index: {}]   ;;  %s903_s6 = inlined_call_operand.vmem [shape: f32[1,128], index: 6, kind: input, shape index: {}]   ;;  %s904_s7 = inlined_call_operand.hbm [shape: f32[8,128], index: 7, kind: output, shape index: {}]  }
   0x1   :  { %13 = vsyncpa [#allocation6], 0 }
   0x2   :  { %14 = vsyncpa [#allocation9], 0 }
   0x3   :  { %15 = vsyncpa [#allocation4], 0  ;;  %s739_s24 = smov [#allocation5]   ;;  %s621_s28 = scalar_lea.hbm %s898_s1, 2048 }
   0x4   :  { %s31_s25 = sshll.u32 %s739_s24, 4  ;;  %p622_p0 = scmp.ne.s32.totalorder %s898_s1, %s621_s28  ;;  %s32_s25 = int_to_ptr.vmem [resolvable:$true] %s31_s25 }
   0x5   :  { %p625_p1 = scmp.lt.u32.totalorder %s621_s28, %s898_s1 }
   0x7   :  { %p627_p2 = pnand %p625_p1, %p622_p0 }
   0x9   :  { %630 = shalt.err (!%p627_p2)
}
   0xa   :  { %s631_s10 = scalar_lea.vmem %s32_s25, 2048  ;;  %p636_p4 = scmp.lt.s32.totalorder %s32_s25, %s32_s25 }
   0xb   :  { %p632_p3 = scmp.ne.s32.totalorder %s32_s25, %s631_s10  ;;  %p637_p5 = scmp.lt.s32.totalorder %s631_s10, %s631_s10 }
   0xd   :  { %p638_p6 = por %p637_p5, %p636_p4 }
   0xf   :  { %p639_p7 = pnand %p638_p6, %p632_p3 }
  0x11   :  { %642 = shalt.err (!%p639_p7)
}
  0x12   :  { %s740_s11 = smov 128   ;;  %s741_s12 = smov 8  }
  0x13   :  { %37 = dma.hbm_to_vmem [thread:$0]  %s898_s1, 2048, %s32_s25, [#allocation6], %s740_s11, %s740_s11, %s741_s12  }
  0x14   :  { %s742_s15 = smov [#allocation2]   ;;  %s743_s17 = smov [#allocation7]  }
  0x15   :  { %s22_s16 = sshll.u32 %s742_s15, 4  ;;  %s45_s18 = sshll.u32 %s743_s17, 4  ;;  %s23_s16 = int_to_ptr.vmem [resolvable:$true] %s22_s16  ;;  %s46_s18 = int_to_ptr.vmem [resolvable:$true] %s45_s18 }
  0x16   :  { %s643_s21 = scalar_lea.hbm %s897_s0, 128 }
  0x17   :  { %p644_p8 = scmp.ne.s32.totalorder %s897_s0, %s643_s21  ;;  %p647_p9 = scmp.lt.u32.totalorder %s643_s21, %s897_s0 }
  0x19   :  { %p649_p10 = pnand %p647_p9, %p644_p8 }
  0x1b   :  { %652 = shalt.err (!%p649_p10)
}
  0x1c   :  { %s653_s1 = scalar_lea.vmem %s23_s16, 128  ;;  %p658_p12 = scmp.lt.s32.totalorder %s23_s16, %s23_s16 }
  0x1d   :  { %p654_p11 = scmp.ne.s32.totalorder %s23_s16, %s653_s1  ;;  %p659_p13 = scmp.lt.s32.totalorder %s653_s1, %s653_s1 }
  0x1f   :  { %p660_p0 = por %p659_p13, %p658_p12 }
  0x21   :  { %p661_p1 = pnand %p660_p0, %p654_p11 }
  0x23   :  { %664 = shalt.err (!%p661_p1)
}
  0x24   :  { %25 = dma.hbm_to_vmem [thread:$0]  %s897_s0, 128, %s23_s16, [#allocation3]  }
  0x25   :  { %s665_s30 = scalar_lea.hbm %s900_s3, 2048 }
  0x26   :  { %p666_p2 = scmp.ne.s32.totalorder %s900_s3, %s665_s30  ;;  %p669_p3 = scmp.lt.u32.totalorder %s665_s30, %s900_s3 }
  0x28   :  { %p671_p4 = pnand %p669_p3, %p666_p2 }
  0x2a   :  { %674 = shalt.err (!%p671_p4)
}
  0x2b   :  { %s675_s14 = scalar_lea.vmem %s46_s18, 2048  ;;  %p680_p6 = scmp.lt.s32.totalorder %s46_s18, %s46_s18 }
  0x2c   :  { %p676_p5 = scmp.ne.s32.totalorder %s46_s18, %s675_s14  ;;  %p681_p7 = scmp.lt.s32.totalorder %s675_s14, %s675_s14 }
  0x2e   :  { %p682_p8 = por %p681_p7, %p680_p6 }
  0x30   :  { %p683_p9 = pnand %p682_p8, %p676_p5 }
  0x32   :  { %686 = shalt.err (!%p683_p9)
}
  0x33   :  { %51 = dma.hbm_to_vmem [thread:$0]  %s900_s3, 2048, %s46_s18, [#allocation6], %s740_s11, %s740_s11, %s741_s12  }
  0x34   :  { %s744_s16 = smov [#allocation8]   ;;  %s687_s21 = scalar_lea.hbm %s902_s5, 2048 }
  0x35   :  { %s59_s17 = sshll.u32 %s744_s16, 4  ;;  %p688_p10 = scmp.ne.s32.totalorder %s902_s5, %s687_s21  ;;  %s60_s17 = int_to_ptr.vmem [resolvable:$true] %s59_s17 }
  0x36   :  { %p691_p11 = scmp.lt.u32.totalorder %s687_s21, %s902_s5 }
  0x38   :  { %p693_p12 = pnand %p691_p11, %p688_p10 }
  0x3a   :  { %696 = shalt.err (!%p693_p12)
}
  0x3b   :  { %s697_s1 = scalar_lea.vmem %s60_s17, 2048  ;;  %p702_p0 = scmp.lt.s32.totalorder %s60_s17, %s60_s17 }
  0x3c   :  { %p698_p13 = scmp.ne.s32.totalorder %s60_s17, %s697_s1  ;;  %p703_p1 = scmp.lt.s32.totalorder %s697_s1, %s697_s1 }
  0x3e   :  { %p704_p2 = por %p703_p1, %p702_p0 }
  0x40   :  { %p705_p3 = pnand %p704_p2, %p698_p13 }
  0x42   :  { %708 = shalt.err (!%p705_p3)
}
  0x43   :  { %65 = dma.hbm_to_vmem [thread:$0]  %s902_s5, 2048, %s60_s17, [#allocation9], %s740_s11, %s740_s11, %s741_s12  }
  0x44   :  { %731 = dma.done.wait [#allocation3], 128  }
  0x45   :  { %732 = vsyncadd [#allocation3], 4294967168 }
  0x46   :  { %733 = dma.done.wait [#allocation6], 4096  }
  0x47   :  { %734 = vsyncadd [#allocation6], 4294963200 }
  0x48   :  { %735 = dma.done.wait [#allocation9], 2048  }
  0x49   :  { %736 = vsyncadd [#allocation9], 4294965248  ;;  %v745_v0 = vmov 0.0|0.0   ;;  %vm746_vm0 = vmmov 0   ;;  %v747_v1 = vmov 0.0   ;;  %v81_v2 = vld [vmem:[#allocation5] sm:$0xff] }
  0x4a   :  { %539 = vmatprep.subr.bf16.mxu0 %v745_v0  ;;  %466 = vmatprep.mubr.msk.f32.mxu0 %vm746_vm0, %v747_v1  ;;  %v82_v3 = vld [vmem:[#allocation5 + $0x8] sm:$0xff]  ;;  %v83_v4 = vld [vmem:[#allocation5 + $0x10] sm:$0xff]  ;;  %v84_v6 = vld [vmem:[#allocation5 + $0x18] sm:$0xff]  ;;  %s748_s28 = smov [#allocation10]  }
  0x4b   :  { %563 = vmatprep.subr.bf16.mxu1 %v745_v0  ;;  %501 = vmatprep.mubr.msk.f32.mxu1 %vm746_vm0, %v747_v1  ;;  %v540_v5 = vpack.c.bf16 %v82_v3, %v81_v2  ;;  %v543_v7 = vpack.c.bf16 %v84_v6, %v83_v4  ;;  %v85_v8 = vld [vmem:[#allocation5 + $0x20] sm:$0xff]  ;;  %v86_v9 = vld [vmem:[#allocation5 + $0x28] sm:$0xff]  ;;  %v177_v12 = vld [vmem:[#allocation7 + $0x10] sm:$0xff]  ;;  %s369_s29 = sshll.u32 %s748_s28, 4  ;;  %s370_s29 = int_to_ptr.vmem [resolvable:$true] %s369_s29 }
  0x4c   :  { %v175_v10 = vld [vmem:[#allocation7] sm:$0xff]  ;;  %v176_v11 = vld [vmem:[#allocation7 + $0x8] sm:$0xff]  ;;  %v178_v13 = vld [vmem:[#allocation7 + $0x18] sm:$0xff]  ;;  %v546_v14 = vpack.c.bf16 %v86_v9, %v85_v8  ;;  %s709_s30 = scalar_lea.vmem %s370_s29, 128  ;;  %p714_p5 = scmp.lt.s32.totalorder %s370_s29, %s370_s29 }
  0x4d   :  { %541 = vmatpush3.bf16.msra.mxu0 %v540_v5  ;;  %v564_v15 = vpack.c.bf16 %v176_v11, %v175_v10  ;;  %v87_v16 = vld [vmem:[#allocation5 + $0x30] sm:$0xff]  ;;  %v88_v17 = vld [vmem:[#allocation5 + $0x38] sm:$0xff]  ;;  %v567_v18 = vpack.c.bf16 %v178_v13, %v177_v12  ;;  %v179_v19 = vld [vmem:[#allocation7 + $0x20] sm:$0xff]  ;;  %p710_p4 = scmp.ne.s32.totalorder %s370_s29, %s709_s30  ;;  %p715_p6 = scmp.lt.s32.totalorder %s709_s30, %s709_s30 }
  0x4e   :  { %542 = vmatprep.subr.bf16.mxu0 %v745_v0  ;;  %v180_v20 = vld [vmem:[#allocation7 + $0x28] sm:$0xff]  ;;  %v549_v21 = vpack.c.bf16 %v88_v17, %v87_v16  ;;  %v89_v22 = vld [vmem:[#allocation5 + $0x40] sm:$0xff]  ;;  %v181_v25 = vld [vmem:[#allocation7 + $0x30] sm:$0xff] }
  0x4f   :  { %565 = vmatpush3.bf16.msra.mxu1 %v564_v15  ;;  %v90_v23 = vld [vmem:[#allocation5 + $0x48] sm:$0xff]  ;;  %v570_v24 = vpack.c.bf16 %v180_v20, %v179_v19  ;;  %v182_v26 = vld [vmem:[#allocation7 + $0x38] sm:$0xff]  ;;  %v91_v28 = vld [vmem:[#allocation5 + $0x50] sm:$0xff]  ;;  %p716_p7 = por %p715_p6, %p714_p5 }
  0x50   :  { %566 = vmatprep.subr.bf16.mxu1 %v745_v0  ;;  %v552_v27 = vpack.c.bf16 %v90_v23, %v89_v22  ;;  %v92_v29 = vld [vmem:[#allocation5 + $0x58] sm:$0xff]  ;;  %v573_v30 = vpack.c.bf16 %v182_v26, %v181_v25  ;;  %v183_v31 = vld [vmem:[#allocation7 + $0x40] sm:$0xff]  ;;  %v184_v32 = vld [vmem:[#allocation7 + $0x48] sm:$0xff] }
  0x51   :  { %544 = vmatpush3.bf16.msra.mxu0 %v543_v7  ;;  %v555_v33 = vpack.c.bf16 %v92_v29, %v91_v28  ;;  %v93_v34 = vld [vmem:[#allocation5 + $0x60] sm:$0xff]  ;;  %v94_v35 = vld [vmem:[#allocation5 + $0x68] sm:$0xff]  ;;  %v576_v36 = vpack.c.bf16 %v184_v32, %v183_v31  ;;  %v185_v37 = vld [vmem:[#allocation7 + $0x50] sm:$0xff]  ;;  %p717_p8 = pnand %p716_p7, %p710_p4 }
  0x52   :  { %545 = vmatprep.subr.bf16.mxu0 %v745_v0  ;;  %v186_v38 = vld [vmem:[#allocation7 + $0x58] sm:$0xff]  ;;  %v558_v39 = vpack.c.bf16 %v94_v35, %v93_v34  ;;  %v95_v40 = vld [vmem:[#allocation5 + $0x70] sm:$0xff]  ;;  %v187_v43 = vld [vmem:[#allocation7 + $0x60] sm:$0xff] }
  0x53   :  { %568 = vmatpush3.bf16.msra.mxu1 %v567_v18  ;;  %v96_v41 = vld [vmem:[#allocation5 + $0x78] sm:$0xff]  ;;  %v579_v42 = vpack.c.bf16 %v186_v38, %v185_v37  ;;  %v188_v44 = vld [vmem:[#allocation7 + $0x68] sm:$0xff]  ;;  %v189_v48 = vld [vmem:[#allocation7 + $0x70] sm:$0xff] }
  0x54   :  { %569 = vmatprep.subr.bf16.mxu1 %v745_v0  ;;  %v561_v45 = vpack.c.bf16 %v96_v41, %v95_v40  ;;  %v582_v46 = vpack.c.bf16 %v188_v44, %v187_v43  ;;  %v80_v47 = vld [vmem:[#allocation2] sm:$0xff]  ;;  %v269_v51 = vld [vmem:[#allocation8] sm:$0xff]  ;;  %v270_v52 = vld [vmem:[#allocation8 + $0x8] sm:$0xff] }
  0x55   :  { %547 = vmatpush3.bf16.msra.mxu0 %v546_v14  ;;  %v190_v49 = vld [vmem:[#allocation7 + $0x78] sm:$0xff]  ;;  %v271_v53 = vld [vmem:[#allocation8 + $0x10] sm:$0xff]  ;;  %v588_v54 = vpack.c.bf16 %v270_v52, %v269_v51  ;;  %v273_v57 = vld [vmem:[#allocation8 + $0x20] sm:$0xff] }
  0x56   :  { %548 = vmatprep.subr.bf16.mxu0 %v745_v0  ;;  %v585_v50 = vpack.c.bf16 %v190_v49, %v189_v48  ;;  %v272_v55 = vld [vmem:[#allocation8 + $0x18] sm:$0xff]  ;;  %v274_v58 = vld [vmem:[#allocation8 + $0x28] sm:$0xff]  ;;  %v275_v60 = vld [vmem:[#allocation8 + $0x30] sm:$0xff] }
  0x57   :  { %571 = vmatpush3.bf16.msra.mxu1 %v570_v24  ;;  %v591_v56 = vpack.c.bf16 %v272_v55, %v271_v53  ;;  %v594_v59 = vpack.c.bf16 %v274_v58, %v273_v57  ;;  %v276_v61 = vld [vmem:[#allocation8 + $0x38] sm:$0xff]  ;;  %v277_v63 = vld [vmem:[#allocation8 + $0x40] sm:$0xff]  ;;  %v279_v3 = vld [vmem:[#allocation8 + $0x50] sm:$0xff] }
  0x58   :  { %572 = vmatprep.subr.bf16.mxu1 %v745_v0  ;;  %v597_v62 = vpack.c.bf16 %v276_v61, %v275_v60  ;;  %v280_v4 = vld [vmem:[#allocation8 + $0x58] sm:$0xff]  ;;  %v281_v6 = vld [vmem:[#allocation8 + $0x60] sm:$0xff]  ;;  %v282_v7 = vld [vmem:[#allocation8 + $0x68] sm:$0xff] }
  0x59   :  { %550 = vmatpush3.bf16.msra.mxu0 %v549_v21  ;;  %v603_v5 = vpack.c.bf16 %v280_v4, %v279_v3  ;;  %v606_v8 = vpack.c.bf16 %v282_v7, %v281_v6  ;;  %v380_v9 = vld [vmem:[%s899_s2] ss:$0 sm:$0xff]  ;;  %v283_v14 = vld [vmem:[#allocation8 + $0x70] sm:$0xff] }
  0x5a   :  { %551 = vmatprep.subr.bf16.mxu0 %v745_v0  ;;  %v284_v15 = vld [vmem:[#allocation8 + $0x78] sm:$0xff] }
  0x5b   :  { %574 = vmatpush3.bf16.msra.mxu1 %v573_v30  ;;  %v609_v16 = vpack.c.bf16 %v284_v15, %v283_v14  ;;  %v381_v17 = vld [vmem:[%s901_s4] ss:$0 sm:$0xff] }
  0x5c   :  { %575 = vmatprep.subr.bf16.mxu1 %v745_v0  ;;  %v382_v21 = vld [vmem:[%s903_s6] ss:$0 sm:$0xff] }
  0x5d   :  { %553 = vmatpush3.bf16.msra.mxu0 %v552_v27 }
  0x5e   :  { %554 = vmatprep.subr.bf16.mxu0 %v745_v0 }
  0x5f   :  { %577 = vmatpush3.bf16.msra.mxu1 %v576_v36 }
  0x60   :  { %578 = vmatprep.subr.bf16.mxu1 %v745_v0 }
  0x61   :  { %556 = vmatpush3.bf16.msra.mxu0 %v555_v33 }
  0x62   :  { %557 = vmatprep.subr.bf16.mxu0 %v745_v0 }
  0x63   :  { %580 = vmatpush3.bf16.msra.mxu1 %v579_v42 }
  0x64   :  { %581 = vmatprep.subr.bf16.mxu1 %v745_v0 }
  0x65   :  { %559 = vmatpush3.bf16.msra.mxu0 %v558_v39 }
  0x66   :  { %560 = vmatprep.subr.bf16.mxu0 %v745_v0 }
  0x67   :  { %583 = vmatpush3.bf16.msra.mxu1 %v582_v46 }
  0x68   :  { %584 = vmatprep.subr.bf16.mxu1 %v745_v0 }
  0x69   :  { %562 = vmatpush3.bf16.msra.mxu0 %v561_v45 }
  0x6a   :  { %587 = vmatprep.subr.bf16.mxu0 %v745_v0 }
  0x6b   :  { %586 = vmatpush3.bf16.msra.mxu1 %v585_v50 }
  0x6c   :  { %467 = vmatmul.mubr.f32.vlgmr.msra.gmra.mrb[0].mxu0 %v80_v47 }
  0x6d   :  { %536 = vmatprep.mubr.msk.f32.mxu0 %vm746_vm0, %v747_v1  ;;  %589 = vmatpush3.bf16.msra.mxu0 %v588_v54  ;;  %v278_v1 = vld [vmem:[#allocation8 + $0x48] sm:$0xff] }
  0x6e   :  { %590 = vmatprep.subr.bf16.mxu0 %v745_v0  ;;  %v600_v2 = vpack.c.bf16 %v278_v1, %v277_v63 }
  0x71   :  { %592 = vmatpush3.bf16.msra.mxu0 %v591_v56 }
  0x72   :  { %593 = vmatprep.subr.bf16.mxu0 %v745_v0 }
  0x75   :  { %595 = vmatpush3.bf16.msra.mxu0 %v594_v59 }
  0x76   :  { %596 = vmatprep.subr.bf16.mxu0 %v745_v0 }
  0x79   :  { %598 = vmatpush3.bf16.msra.mxu0 %v597_v62 }
  0x7a   :  { %599 = vmatprep.subr.bf16.mxu0 %v745_v0 }
  0x7d   :  { %601 = vmatpush3.bf16.msra.mxu0 %v600_v2 }
  0x7e   :  { %602 = vmatprep.subr.bf16.mxu0 %v745_v0 }
  0x81   :  { %604 = vmatpush3.bf16.msra.mxu0 %v603_v5 }
  0x82   :  { %605 = vmatprep.subr.bf16.mxu0 %v745_v0 }
  0x85   :  { %607 = vmatpush3.bf16.msra.mxu0 %v606_v8 }
  0x86   :  { %608 = vmatprep.subr.bf16.mxu0 %v745_v0 }
  0x89   :  { %610 = vmatpush3.bf16.msra.mxu0 %v609_v16 }
 0x13f   :  { %v170_v10 = vpop.f32.mrb[0].mxu0 }
 0x140   :  { %v171_v11 = vadd.f32 %v380_v9, %v170_v10  ;;  %v468_v12 = vpop.f32.mrb[1].mxu0 }
 0x142   :  { %v174_v13 = vmax.f32 %v171_v11, 0.0 }
 0x144   :  { %502 = vmatmul.mubr.f32.vlgmr.msra.gmra.mrb[0].mxu1 %v174_v13 }
 0x217   :  { %v264_v18 = vpop.f32.mrb[0].mxu1 }
 0x218   :  { %v265_v19 = vadd.f32 %v381_v17, %v264_v18  ;;  %v503_v0 = vpop.f32.mrb[1].mxu1 }
 0x21a   :  { %v268_v20 = vmax.f32 %v265_v19, 0.0 }
 0x21c   :  { %537 = vmatmul.mubr.f32.vlgmr.msra.gmra.mrb[2].mxu0 %v268_v20 }
 0x2ef   :  { %v358_v22 = vpop.f32.mrb[2].mxu0 }
 0x2f0   :  { %v359_v23 = vadd.f32 %v382_v21, %v358_v22  ;;  %v538_v24 = vpop.f32.mrb[3].mxu0 }
 0x2f2   :  { %362 = vst [vmem:[#allocation10] sm:$0xff] %v359_v23 }
 0x2f3   :  { %720 = shalt.err (!%p717_p8)
}
 0x2f4   :  { %s721_s9 = scalar_lea.hbm %s904_s7, 128 }
 0x2f5   :  { %p722_p9 = scmp.ne.s32.totalorder %s904_s7, %s721_s9  ;;  %p725_p10 = scmp.lt.u32.totalorder %s721_s9, %s904_s7 }
 0x2f7   :  { %p727_p11 = pnand %p725_p10, %p722_p9 }
 0x2f9   :  { %730 = shalt.err (!%p727_p11)
}
 0x2fa   :  { %372 = dma.vmem_to_hbm [thread:$0]  %s370_s29, 128, %s904_s7, [#allocation4]  }
 0x2fb   :  { %737 = dma.done.wait [#allocation4], 128  }
 0x2fc   :  { %738 = vsyncadd [#allocation4], 4294967168 }
 0x2fd   :  { %376 = vsyncpa [#allocation3], 1 }
 0x2fe   :  { %377 = vsyncpa [#allocation6], 1 }
 0x2ff   :  { %378 = vsyncpa [#allocation9], 1 }
 0x300   :  { %379 = vsyncpa [#allocation4], 1 }

</bundles_post_ra>
